<compile_context>
chip_gen: v7x
topology: tpu7x:2x2x1
jax: 0.10.0
libtpu: 0.0.40
codegen_flags: <defaults>
</compile_context>

<pallas_src>
import functools

import jax
import jax.numpy as jnp
from jax.experimental import pallas as pl
from jax.experimental.pallas import tpu as pltpu


def _avg_readout_kernel(seq_ref, out_ref, *, n_total, node_tile,
                        blocks_per_split, needs_mask):
    # Grid is (n_splits, blocks_per_split); node (reduction) axis is last.
    k = pl.program_id(1)

    @pl.when(k == 0)
    def _():
        out_ref[...] = jnp.zeros_like(out_ref)

    x = seq_ref[...]
    if needs_mask:
        # Mask rows past the true node count (tail block and fully-phantom
        # blocks whose index_map was clamped).
        c = pl.program_id(0)
        start = (c * blocks_per_split + k) * node_tile
        valid = n_total - start  # <= 0 for phantom blocks -> mask everything
        row_ids = jax.lax.broadcasted_iota(jnp.int32, (1, node_tile, 1), 1)
        x = jnp.where(row_ids < valid, x, jnp.zeros((), x.dtype))

    # Fused f32-accumulating reduce over the node axis; accumulate directly in
    # the resident f32 output block (no scratch, no full-tile f32 upcast).
    out_ref[0] = out_ref[0] + jnp.sum(x, axis=1, dtype=jnp.float32)


def _sublane_pack(itemsize):
    # f32 -> 8, bf16 -> 16, int8/fp8 -> 32 (sub-32-bit packs along sublanes).
    return max(8, 32 // itemsize)


def _vmem_capacity_bytes():
    try:
        info = pltpu.get_tpu_info()
        cap = getattr(info, "vmem_capacity_bytes", None)
        if cap:
            return int(cap)
    except Exception:
        pass
    return 64 << 20  # conservative: v7x per-TensorCore VMEM


def _choose_node_tile(B, N, D, itemsize, budget_bytes):
    """Largest sublane-aligned node tile whose double-buffered input block fits
    `budget_bytes`.  Does not need to divide N (the tail is masked in-kernel)."""
    pack = _sublane_pack(itemsize)
    row_bytes = max(1, B * D * itemsize)      # one node row across the batch
    nt = budget_bytes // (2 * row_bytes)      # 2x: BlockSpec double-buffers
    nt = max(pack, (nt // pack) * pack)
    return int(min(nt, max(N, 1)))


def avg_readout(seq, *, node_tile=None, min_kernel_bytes=1 << 20):
    """Pallas equivalent of AvgReadout.forward: mean over axis 1 of (B, N, D)."""
    assert seq.ndim == 3, "AvgReadout expects a (batch, nodes, hidden) input"
    B, N, D = seq.shape
    itemsize = jnp.dtype(seq.dtype).itemsize
    total_bytes = B * N * D * itemsize

    # Tiny inputs: XLA's native reduce beats kernel-launch + per-step overhead.
    if total_bytes < min_kernel_bytes:
        return jnp.mean(seq.astype(jnp.float32), axis=1).astype(seq.dtype)

    # Generation-aware VMEM sizing:
    #   v5e/v6e (128 MiB VMEM) -> 32 MiB double-buffered tile budget, 96 MiB limit
    #   v7x     ( 64 MiB VMEM) -> 16 MiB budget,                      48 MiB limit
    vmem_cap = _vmem_capacity_bytes()
    budget = min(max(vmem_cap // 4, 8 << 20), 32 << 20)
    vmem_limit = min(max(vmem_cap * 3 // 4, 32 << 20), 96 << 20)

    if node_tile is None:
        node_tile = _choose_node_tile(B, N, D, itemsize, budget)
    node_tile = int(min(node_tile, N))
    pack = _sublane_pack(itemsize)
    assert node_tile == N or node_tile % pack == 0, \
        "node tile must be sublane-aligned or equal the full node dimension"

    node_blocks = pl.cdiv(N, node_tile)
    # 2-way "parallel" node split -> per-split partial sums.  Free-ish on
    # single-TC chips, drives both TensorCores' DMA engines on v7x, and keeps
    # every DMA a contiguous (node_tile, D) slab (no hidden-axis striding).
    n_splits = 2 if node_blocks >= 2 else 1
    blocks_per_split = pl.cdiv(node_blocks, n_splits)
    covered_blocks = n_splits * blocks_per_split
    needs_clamp = covered_blocks != node_blocks          # one phantom block max
    needs_mask = (node_blocks * node_tile != N) or needs_clamp

    def in_index_map(c, k):
        blk = c * blocks_per_split + k
        if needs_clamp:
            # Phantom block: clamp to a valid block (its data is fully masked).
            blk = jnp.minimum(blk, node_blocks - 1)
        return (0, blk, 0)

    kernel = functools.partial(
        _avg_readout_kernel, n_total=N, node_tile=node_tile,
        blocks_per_split=blocks_per_split, needs_mask=needs_mask)

    cost = pl.CostEstimate(
        flops=B * N * D,
        transcendentals=0,
        bytes_accessed=total_bytes + n_splits * B * D * 4)

    partial_sums = pl.pallas_call(
        kernel,
        out_shape=jax.ShapeDtypeStruct((n_splits, B, D), jnp.float32),
        grid_spec=pltpu.PrefetchScalarGridSpec(
            num_scalar_prefetch=0,
            grid=(n_splits, blocks_per_split),
            in_specs=[pl.BlockSpec((B, node_tile, D), in_index_map)],
            # Output block index constant across the reduction axis -> the f32
            # partial-sum block stays resident in VMEM (accumulator pattern).
            out_specs=pl.BlockSpec((1, B, D), lambda c, k: (c, 0, 0)),
        ),
        compiler_params=pltpu.CompilerParams(
            dimension_semantics=("parallel", "arbitrary"),
            vmem_limit_bytes=int(vmem_limit),
        ),
        cost_estimate=cost,
    )(seq)

    # Combine the per-split partial sums and divide by the true node count.
    return (jnp.sum(partial_sums, axis=0) / jnp.float32(N)).astype(seq.dtype)


if __name__ == "__main__":
    key = jax.random.PRNGKey(0)

    # Test 1: small shape consistent with the module (batch, nodes, hidden),
    # forcing the Pallas path (min_kernel_bytes=0).  Single block, no masking.
    B, N, D = 2, 8, 32
    seq = jax.random.normal(key, (B, N, D), dtype=jnp.float32)
    out = jax.block_until_ready(avg_readout(seq, min_kernel_bytes=0))
    ref = jnp.mean(seq, axis=1)
    assert out.shape == (B, D)
    assert out.dtype == seq.dtype
    assert jnp.allclose(out, ref, atol=1e-5, rtol=1e-5)

    # Same small shape through the tiny-input fallback path (default threshold).
    out_fb = jax.block_until_ready(avg_readout(seq))
    assert jnp.allclose(out_fb, ref, atol=1e-5, rtol=1e-5)

    # Test 2: bf16 input with a node count that is NOT a multiple of the tile
    # (exercises tail masking, the clamped phantom block, and the 2-way
    # "parallel" node split with wrapper-side combine).
    B2, N2, D2 = 2, 300, 256
    seq2 = jax.random.normal(jax.random.PRNGKey(1), (B2, N2, D2),
                             dtype=jnp.bfloat16)
    out2 = jax.block_until_ready(
        avg_readout(seq2, node_tile=64, min_kernel_bytes=0))
    ref2 = jnp.mean(seq2.astype(jnp.float32), axis=1).astype(jnp.bfloat16)
    assert out2.shape == (B2, D2)
    assert out2.dtype == seq2.dtype
    assert jnp.allclose(out2.astype(jnp.float32), ref2.astype(jnp.float32),
                        atol=2e-2, rtol=2e-2)

    print("KERNEL_OK")
</pallas_src>

<mosaic_0001>
module attributes {stable_mosaic.version = 11 : i64} {
  func.func @_avg_readout_kernel(%arg0: i32, %arg1: i32, %arg2: memref<2x8x32xf32, #tpu.memory_space<vmem>>, %arg3: memref<1x2x32xf32, #tpu.memory_space<vmem>>) attributes {dimension_semantics = [#tpu.dimension_semantics<parallel>, #tpu.dimension_semantics<arbitrary>], iteration_bounds = array<i64: 1, 1>, scalar_prefetch = 0 : i64, scratch_operands = 0 : i64, tpu.core_type = #tpu.core_type<tc>, window_params = [{transform_indices = @transform_0, window_bounds = array<i64: 2, 8, 32>}, {transform_indices = @transform_1, window_bounds = array<i64: 1, 2, 32>}]} {
    %c0_i32 = arith.constant 0 : i32
    %0 = arith.cmpi eq, %arg1, %c0_i32 : i32
    %1 = arith.extui %0 : i1 to i32
    %c0_i32_0 = arith.constant 0 : i32
    %2 = arith.cmpi ne, %1, %c0_i32_0 : i32
    scf.if %2 {
      %cst_9 = arith.constant 0.000000e+00 : f32
      %11 = vector.broadcast %cst_9 : f32 to vector<1x2x32xf32>
      %c0_10 = arith.constant 0 : index
      %c0_11 = arith.constant 0 : index
      %c0_12 = arith.constant 0 : index
      %12 = vector.load %arg3[%c0_10, %c0_11, %c0_12] : memref<1x2x32xf32, #tpu.memory_space<vmem>>, vector<1x2x32xf32>
      tpu.vector_store %arg3[%c0_10, %c0_11, %c0_12], %11 {strides = array<i32>} : memref<1x2x32xf32, #tpu.memory_space<vmem>>, vector<1x2x32xf32>,
    } else {
    }
    %c0 = arith.constant 0 : index
    %c0_1 = arith.constant 0 : index
    %c0_2 = arith.constant 0 : index
    %3 = vector.load %arg2[%c0, %c0_1, %c0_2] : memref<2x8x32xf32, #tpu.memory_space<vmem>>, vector<2x8x32xf32>
    %c0_3 = arith.constant 0 : index
    %c0_4 = arith.constant 0 : index
    %c0_5 = arith.constant 0 : index
    %4 = vector.load %arg3[%c0_3, %c0_4, %c0_5] : memref<1x2x32xf32, #tpu.memory_space<vmem>>, vector<1x2x32xf32>
    %5 = vector.shape_cast %4 : vector<1x2x32xf32> to vector<2x32xf32>
    %cst = arith.constant dense<0.000000e+00> : vector<2x32xf32>
    %6 = vector.multi_reduction <add>, %3, %cst [1] : vector<2x8x32xf32> to vector<2x32xf32>
    %7 = arith.addf %5, %6 : vector<2x32xf32>
    %c0_6 = arith.constant 0 : index
    %c0_7 = arith.constant 0 : index
    %c0_8 = arith.constant 0 : index
    %8 = vector.load %arg3[%c0_6, %c0_7, %c0_8] : memref<1x2x32xf32, #tpu.memory_space<vmem>>, vector<1x2x32xf32>
    %9 = vector.shape_cast %8 : vector<1x2x32xf32> to vector<2x32xf32>
    %10 = vector.shape_cast %7 : vector<2x32xf32> to vector<1x2x32xf32>
    tpu.vector_store %arg3[%c0_6, %c0_7, %c0_8], %10 {strides = array<i32>} : memref<1x2x32xf32, #tpu.memory_space<vmem>>, vector<1x2x32xf32>,
    return
  }
  func.func @transform_0(%arg0: i32, %arg1: i32) -> (i32, i32, i32) {
    %c1_i32 = arith.constant 1 : i32
    %0 = arith.muli %arg0, %c1_i32 : i32
    %1 = arith.addi %0, %arg1 : i32
    %c0_i32 = arith.constant 0 : i32
    %c0_i32_0 = arith.constant 0 : i32
    %c0_i32_1 = arith.constant 0 : i32
    return %c0_i32, %1, %c0_i32_0 : i32, i32, i32
  }
  func.func @transform_1(%arg0: i32, %arg1: i32) -> (i32, i32, i32) {
    %c0_i32 = arith.constant 0 : i32
    %c0_i32_0 = arith.constant 0 : i32
    %c0_i32_1 = arith.constant 0 : i32
    return %arg0, %c0_i32, %c0_i32_0 : i32, i32, i32
  }
}

</mosaic_0001>

<bundles_post_ra>
// kernel: tpu_custom_call.1
= control target key start
LH: loop header
LB: loop body
LE: loop exit
PB: predicated region body
PF: predicated region fallthrough
CT: control target
= control target key end

     0   :  { %6 = vsyncpa [#allocation3], 0  ;;  %s168_s0 = inlined_call_operand.hbm [shape: f32[2,8,32], index: 0, kind: input, shape index: {}]   ;;  %s169_s1 = inlined_call_operand.hbm [shape: f32[1,2,32], index: 1, kind: output, shape index: {}]  }
   0x1   :  { %7 = vsyncpa [#allocation4], 0  ;;  %s127_s6 = smov [#allocation2]   ;;  %s79_s10 = scalar_lea.hbm %s168_s0, 256 }
   0x2   :  { %s16_s7 = sshll.u32 %s127_s6, 4  ;;  %p80_p0 = scmp.ne.s32.totalorder %s168_s0, %s79_s10  ;;  %s17_s7 = int_to_ptr.vmem [resolvable:$true] %s16_s7 }
   0x3   :  { %p83_p1 = scmp.lt.u32.totalorder %s79_s10, %s168_s0 }
   0x5   :  { %p85_p2 = pnand %p83_p1, %p80_p0 }
   0x7   :  { %88 = shalt.err (!%p85_p2)
}
   0x8   :  { %s89_s15 = scalar_lea.vmem %s17_s7, 256  ;;  %p94_p4 = scmp.lt.s32.totalorder %s17_s7, %s17_s7 }
   0x9   :  { %p90_p3 = scmp.ne.s32.totalorder %s17_s7, %s89_s15  ;;  %p95_p5 = scmp.lt.s32.totalorder %s89_s15, %s89_s15 }
   0xb   :  { %p96_p6 = por %p95_p5, %p94_p4 }
   0xd   :  { %p97_p7 = pnand %p96_p6, %p90_p3 }
   0xf   :  { %100 = shalt.err (!%p97_p7)
}
  0x10   :  { %s128_s16 = smov 128   ;;  %s129_s17 = smov 8  }
  0x11   :  { %22 = dma.hbm_to_vmem [thread:$0]  %s168_s0, 256, %s17_s7, [#allocation3], %s128_s16, %s128_s16, %s129_s17  }
  0x12   :  { %123 = dma.done.wait [#allocation3], 256  }
  0x13   :  { %124 = vsyncadd [#allocation3], 4294967040  ;;  %vm31_vm0 = vcmask 254976   ;;  %v130_v0 = vmov 0.0   ;;  %vm36_vm1 = vcmask 261120   ;;  %v33_v1 = vld [vmem:[#allocation2] sm:$0xff] }
  0x14   :  { %32 = vst.msk [vmem:[#allocation5] sm:$0x3] %vm31_vm0, %v130_v0  ;;  %v34_v2 = vld [vmem:[#allocation2 + $0x8] sm:$0xff]  ;;  %v37_v3 = vsel %vm36_vm1, %v33_v1, 0.0  ;;  %vm53_vm2 = vcmask 1041409   ;;  %s131_s0 = smov [#allocation5]  }
  0x15   :  { %v44_v4 = vsel %vm36_vm1, %v34_v2, 0.0  ;;  %v38_v5 = vrot.slane %v37_v3, 4  ;;  %s65_s20 = sshll.u32 %s131_s0, 4  ;;  %s66_s20 = int_to_ptr.vmem [resolvable:$true] %s65_s20 }
  0x16   :  { %v45_v6 = vrot.slane %v44_v4, 4  ;;  %s101_s21 = scalar_lea.vmem %s66_s20, 32  ;;  %p106_p9 = scmp.lt.s32.totalorder %s66_s20, %s66_s20 }
  0x17   :  { %v39_v7 = vadd.f32 %v38_v5, %v37_v3  ;;  %p102_p8 = scmp.ne.s32.totalorder %s66_s20, %s101_s21  ;;  %p107_p10 = scmp.lt.s32.totalorder %s101_s21, %s101_s21 }
  0x18   :  { %v46_v8 = vadd.f32 %v45_v6, %v44_v4 }
  0x19   :  { %v40_v9 = vrot.slane %v39_v7, 2  ;;  %p108_p11 = por %p107_p10, %p106_p9 }
  0x1a   :  { %v47_v10 = vrot.slane %v46_v8, 2 }
  0x1b   :  { %v41_v11 = vadd.f32 %v40_v9, %v39_v7  ;;  %v35_v15 = vld [vmem:[#allocation5] sm:$0x3]  ;;  %p109_p12 = pnand %p108_p11, %p102_p8 }
  0x1c   :  { %v48_v12 = vadd.f32 %v47_v10, %v46_v8 }
  0x1d   :  { %v42_v13 = vrot.slane %v41_v11, 1 }
  0x1e   :  { %v49_v14 = vrot.slane %v48_v12, 1 }
  0x1f   :  { %v43_v16 = vadd.f32 %v42_v13, %v41_v11 }
  0x20   :  { %v50_v17 = vadd.f32 %v49_v14, %v48_v12 }
  0x22   :  { %v54_v18 = vsel %vm53_vm2, %v50_v17, %v43_v16 }
  0x23   :  { %v56_v19 = vadd.f32 %v54_v18, %v35_v15 }
  0x25   :  { %58 = vst.msk [vmem:[#allocation5] sm:$0x3] %vm31_vm0, %v56_v19 }
  0x26   :  { %112 = shalt.err (!%p109_p12)
}
  0x27   :  { %s113_s24 = scalar_lea.hbm %s169_s1, 32 }
  0x28   :  { %p114_p13 = scmp.ne.s32.totalorder %s169_s1, %s113_s24  ;;  %p117_p0 = scmp.lt.u32.totalorder %s113_s24, %s169_s1 }
  0x2a   :  { %p119_p1 = pnand %p117_p0, %p114_p13 }
  0x2c   :  { %122 = shalt.err (!%p119_p1)
}
  0x2d   :  { %68 = dma.vmem_to_hbm [thread:$0]  %s66_s20, 32, %s169_s1, [#allocation4]  }
  0x2e   :  { %125 = dma.done.wait [#allocation4], 32  }
  0x2f   :  { %126 = vsyncadd [#allocation4], 4294967264 }
  0x30   :  { %72 = vsyncpa [#allocation3], 1 }
  0x31   :  { %73 = vsyncpa [#allocation4], 1 }

</bundles_post_ra>
